<compile_context>
chip_gen: v7x
topology: tpu7x:2x2x1
jax: 0.10.0
libtpu: 0.0.40
codegen_flags: <defaults>
</compile_context>

<pallas_src>
import jax
import jax.numpy as jnp
from jax.experimental import pallas as pl
from jax.experimental.pallas import tpu as pltpu

EPS = 1e-5


# --------------------------------------------------------------------------- #
# Kernel
# --------------------------------------------------------------------------- #
def _mem_emb_mnn_kernel(
    x_ref,    # (B, D_in)        f32   input_symbol
    a_ref,    # (B, D_in)        f32   action
    mem_ref,  # (B, M_in)        f32   memory at time t
    w1_ref,   # (D_in, E_pad)    bf16  linear1 weight (pre-transposed, padded)
    bn1_ref,  # (2, E_pad)       f32   row 0 = gamma1, row 1 = beta1
    w2_ref,   # (2*E_pad+M_in, TN) bf16 linear2 weight block (output-feature tile)
    bn2_ref,  # (2, TN)          f32   row 0 = gamma2, row 1 = beta2 (tile)
    o_ref,    # (B, TN)          f32   output tile (padded memory at t+1)
    ie_ref,   # scratch VMEM (B, E_pad) bf16 — input embedding, persists over grid
    ae_ref,   # scratch VMEM (B, E_pad) bf16 — action embedding, persists over grid
):
    e_pad = ie_ref.shape[1]

    # ---- stage 1: linear1 + BN1 + ReLU, once, kept resident in VMEM scratch --
    @pl.when(pl.program_id(0) == 0)
    def _():
        w1 = w1_ref[...]                       # bf16, resident
        g1 = bn1_ref[0:1, :]
        b1 = bn1_ref[1:2, :]

        def embed(z):
            h = jnp.dot(z.astype(jnp.bfloat16), w1,
                        preferred_element_type=jnp.float32)
            mu = jnp.mean(h, axis=0, keepdims=True)
            var = jnp.mean((h - mu) ** 2, axis=0, keepdims=True)  # two-pass, safe
            scale = g1 * jax.lax.rsqrt(var + EPS)
            shift = b1 - mu * scale
            return jnp.maximum(h * scale + shift, 0.0).astype(jnp.bfloat16)

        ie_ref[...] = embed(x_ref[...])
        ae_ref[...] = embed(a_ref[...])

    # ---- stage 2 (per output-feature tile): linear2 + BN2 + sigmoid ----------
    # Three accumulating dots against static slices of the w2 block: avoids
    # materializing a (B, 2E+M) concat copy in VMEM.
    f = jnp.dot(ie_ref[...], w2_ref[0:e_pad, :],
                preferred_element_type=jnp.float32)
    f = f + jnp.dot(ae_ref[...], w2_ref[e_pad:2 * e_pad, :],
                    preferred_element_type=jnp.float32)
    f = f + jnp.dot(mem_ref[...].astype(jnp.bfloat16), w2_ref[2 * e_pad:, :],
                    preferred_element_type=jnp.float32)

    g2 = bn2_ref[0:1, :]
    b2 = bn2_ref[1:2, :]
    mu = jnp.mean(f, axis=0, keepdims=True)
    var = jnp.mean((f - mu) ** 2, axis=0, keepdims=True)
    scale = g2 * jax.lax.rsqrt(var + EPS)
    shift = b2 - mu * scale
    o_ref[...] = jax.nn.sigmoid(f * scale + shift)


# --------------------------------------------------------------------------- #
# One-time parameter packing (off the hot path)
# --------------------------------------------------------------------------- #
def _round_up(x, m):
    return ((x + m - 1) // m) * m


def pack_params(params):
    """Transpose, pad feature dims to multiples of 128 and cast weights to bf16.

    Called once; the forward wrapper does no per-call packing.
    Linear biases b1/b2 are intentionally dropped: with batch-statistics
    BatchNorm a per-column constant is exactly cancelled by the mean term.
    """
    E, D_in = params["w1"].shape             # PyTorch layout: (E, D_in)
    M, flat = params["w2"].shape             # PyTorch layout: (M, 2E+M)
    assert flat == 2 * E + M
    E_pad = max(_round_up(E, 128), 128)
    M_pad = max(_round_up(M, 128), 128)

    w1p = jnp.zeros((D_in, E_pad), jnp.float32).at[:, :E].set(params["w1"].T)
    bn1 = (jnp.zeros((2, E_pad), jnp.float32)
           .at[0, :E].set(params["gamma1"])
           .at[1, :E].set(params["beta1"]))

    w2_t = params["w2"].T                    # (2E+M, M)
    kf = 2 * E_pad + M
    w2p = jnp.zeros((kf, M_pad), jnp.float32)
    w2p = w2p.at[0:E, :M].set(w2_t[0:E])                       # input-embedding rows
    w2p = w2p.at[E_pad:E_pad + E, :M].set(w2_t[E:2 * E])       # action-embedding rows
    w2p = w2p.at[2 * E_pad:, :M].set(w2_t[2 * E:])             # memory rows
    bn2 = (jnp.zeros((2, M_pad), jnp.float32)
           .at[0, :M].set(params["gamma2"])
           .at[1, :M].set(params["beta2"]))

    return {
        "w1": w1p.astype(jnp.bfloat16),
        "bn1": bn1,
        "w2": w2p.astype(jnp.bfloat16),
        "bn2": bn2,
        "E_pad": E_pad, "M": M, "M_pad": M_pad,
    }


# --------------------------------------------------------------------------- #
# Forward wrapper
# --------------------------------------------------------------------------- #
def mem_emb_mnn_forward(input_symbol, action, memory, packed):
    B, D_in = input_symbol.shape
    M_in = memory.shape[1]
    E_pad, M, M_pad = packed["E_pad"], packed["M"], packed["M_pad"]
    kf = packed["w2"].shape[0]               # 2*E_pad + M_in

    tn = 256 if M_pad % 256 == 0 else 128    # output-feature tile (lane-dense)
    grid = (M_pad // tn,)

    grid_spec = pltpu.PrefetchScalarGridSpec(
        num_scalar_prefetch=0,
        grid=grid,
        in_specs=[
            pl.BlockSpec((B, D_in), lambda j: (0, 0)),        # input_symbol (resident)
            pl.BlockSpec((B, D_in), lambda j: (0, 0)),        # action (resident)
            pl.BlockSpec((B, M_in), lambda j: (0, 0)),        # memory (resident)
            pl.BlockSpec((D_in, E_pad), lambda j: (0, 0)),    # w1 (resident)
            pl.BlockSpec((2, E_pad), lambda j: (0, 0)),       # bn1 (resident)
            pl.BlockSpec((kf, tn), lambda j: (0, j)),         # w2 tile (pipelined)
            pl.BlockSpec((2, tn), lambda j: (0, j)),          # bn2 tile (pipelined)
        ],
        out_specs=pl.BlockSpec((B, tn), lambda j: (0, j)),
        scratch_shapes=[
            pltpu.VMEM((B, E_pad), jnp.bfloat16),             # input embedding
            pltpu.VMEM((B, E_pad), jnp.bfloat16),             # action embedding
        ],
    )

    out_pad = pl.pallas_call(
        _mem_emb_mnn_kernel,
        out_shape=jax.ShapeDtypeStruct((B, M_pad), jnp.float32),
        grid_spec=grid_spec,
        compiler_params=pltpu.CompilerParams(
            # stage-1 scratch is written at j==0 and reused -> grid axis is a
            # dependent ("arbitrary") axis, not megacore-parallel.
            dimension_semantics=("arbitrary",),
            vmem_limit_bytes=48 * 1024 * 1024,  # below v7x's 64 MiB physical
        ),
    )(input_symbol, action, memory,
      packed["w1"], packed["bn1"], packed["w2"], packed["bn2"])

    # Drop the lane-padding columns (identity when M is already a multiple of 128).
    return out_pad[:, :M]


# --------------------------------------------------------------------------- #
# Init + pure-JAX reference (true f32 module semantics)
# --------------------------------------------------------------------------- #
def init_params(key, input_dim, memory_dim, embedding_dim):
    """Deterministic init (uniform +/- 1/sqrt(fan_in), like nn.Linear)."""
    flat_size = 2 * embedding_dim + memory_dim
    k1, k2, k3, k4 = jax.random.split(key, 4)
    lim1 = 1.0 / jnp.sqrt(jnp.float32(input_dim))
    lim2 = 1.0 / jnp.sqrt(jnp.float32(flat_size))
    return {
        "w1": jax.random.uniform(k1, (embedding_dim, input_dim), jnp.float32, -lim1, lim1),
        "b1": jax.random.uniform(k2, (embedding_dim,), jnp.float32, -lim1, lim1),
        "gamma1": jnp.ones((embedding_dim,), jnp.float32),
        "beta1": jnp.zeros((embedding_dim,), jnp.float32),
        "w2": jax.random.uniform(k3, (memory_dim, flat_size), jnp.float32, -lim2, lim2),
        "b2": jax.random.uniform(k4, (memory_dim,), jnp.float32, -lim2, lim2),
        "gamma2": jnp.ones((memory_dim,), jnp.float32),
        "beta2": jnp.zeros((memory_dim,), jnp.float32),
    }


def _reference_forward(x, a, mem, params):
    """Pure-JAX f32 reference matching the PyTorch module (training-mode BN)."""
    def bn(h, g, b):
        mu = jnp.mean(h, axis=0, keepdims=True)
        var = jnp.mean((h - mu) ** 2, axis=0, keepdims=True)
        return (h - mu) / jnp.sqrt(var + EPS) * g + b

    def embed(z):
        h = z @ params["w1"].T + params["b1"]
        return jnp.maximum(bn(h, params["gamma1"], params["beta1"]), 0.0)

    ie, ae = embed(x), embed(a)
    flat = jnp.concatenate([ie, ae, mem], axis=1)
    f = flat @ params["w2"].T + params["b2"]
    return jax.nn.sigmoid(bn(f, params["gamma2"], params["beta2"]))


if __name__ == "__main__":
    # Small shapes consistent with the module.
    B = 8
    input_dim = target_dim = 16
    embedding_dim = 32
    memory_dim = 32

    key = jax.random.PRNGKey(0)
    kx, ka, km, kp = jax.random.split(key, 4)
    input_symbol = jax.random.normal(kx, (B, input_dim), jnp.float32)
    action = jax.random.normal(ka, (B, target_dim), jnp.float32)
    memory = jax.random.normal(km, (B, memory_dim), jnp.float32)

    params = init_params(kp, input_dim, memory_dim, embedding_dim)
    packed = pack_params(params)          # one-time packing, off the hot path
    jax.block_until_ready((packed["w1"], packed["bn1"], packed["w2"], packed["bn2"]))

    out = mem_emb_mnn_forward(input_symbol, action, memory, packed)
    out = jax.block_until_ready(out)

    ref = _reference_forward(input_symbol, action, memory, params)
    assert out.shape == (B, memory_dim)
    # Tolerance is loosened vs the f32 reference because MXU operands are bf16.
    assert jnp.allclose(out, ref, atol=5e-2, rtol=0.0), (
        "mismatch vs reference, max abs err = "
        f"{float(jnp.max(jnp.abs(out - ref)))}")

    print("KERNEL_OK")
</pallas_src>

<mosaic_0001>
module attributes {stable_mosaic.version = 11 : i64} {
  func.func @_mem_emb_mnn_kernel(%arg0: i32, %arg1: memref<8x16xf32, #tpu.memory_space<vmem>>, %arg2: memref<8x16xf32, #tpu.memory_space<vmem>>, %arg3: memref<8x32xf32, #tpu.memory_space<vmem>>, %arg4: memref<16x128xbf16, #tpu.memory_space<vmem>>, %arg5: memref<2x128xf32, #tpu.memory_space<vmem>>, %arg6: memref<288x128xbf16, #tpu.memory_space<vmem>>, %arg7: memref<2x128xf32, #tpu.memory_space<vmem>>, %arg8: memref<8x128xf32, #tpu.memory_space<vmem>>, %arg9: memref<8x128xbf16, #tpu.memory_space<vmem>>, %arg10: memref<8x128xbf16, #tpu.memory_space<vmem>>) attributes {dimension_semantics = [#tpu.dimension_semantics<arbitrary>], iteration_bounds = array<i64: 1>, scalar_prefetch = 0 : i64, scratch_operands = 2 : i64, tpu.core_type = #tpu.core_type<tc>, window_params = [{pipeline_mode = #tpu.pipeline_mode<synchronous>, transform_indices = @transform_0, window_bounds = array<i64: 8, 16>}, {pipeline_mode = #tpu.pipeline_mode<synchronous>, transform_indices = @transform_1, window_bounds = array<i64: 8, 16>}, {pipeline_mode = #tpu.pipeline_mode<synchronous>, transform_indices = @transform_2, window_bounds = array<i64: 8, 32>}, {pipeline_mode = #tpu.pipeline_mode<synchronous>, transform_indices = @transform_3, window_bounds = array<i64: 16, 128>}, {pipeline_mode = #tpu.pipeline_mode<synchronous>, transform_indices = @transform_4, window_bounds = array<i64: 2, 128>}, {transform_indices = @transform_5, window_bounds = array<i64: 288, 128>}, {transform_indices = @transform_6, window_bounds = array<i64: 2, 128>}, {transform_indices = @transform_7, window_bounds = array<i64: 8, 128>}]} {
    %c0_i32 = arith.constant 0 : i32
    %0 = arith.cmpi eq, %arg0, %c0_i32 : i32
    %1 = arith.extui %0 : i1 to i32
    %c0_i32_0 = arith.constant 0 : i32
    %2 = arith.cmpi ne, %1, %c0_i32_0 : i32
    scf.if %2 {
      %c0_23 = arith.constant 0 : index
      %c0_24 = arith.constant 0 : index
      %44 = vector.load %arg4[%c0_23, %c0_24] : memref<16x128xbf16, #tpu.memory_space<vmem>>, vector<16x128xbf16>
      %c0_25 = arith.constant 0 : index
      %c0_26 = arith.constant 0 : index
      %45 = vector.load %arg5[%c0_25, %c0_26] : memref<2x128xf32, #tpu.memory_space<vmem>>, vector<1x128xf32>
      %c1_27 = arith.constant 1 : index
      %c0_28 = arith.constant 0 : index
      %46 = vector.load %arg5[%c1_27, %c0_28] : memref<2x128xf32, #tpu.memory_space<vmem>>, vector<1x128xf32>
      %c0_29 = arith.constant 0 : index
      %c0_30 = arith.constant 0 : index
      %47 = vector.load %arg1[%c0_29, %c0_30] : memref<8x16xf32, #tpu.memory_space<vmem>>, vector<8x16xf32>
      %48 = arith.truncf %47 : vector<8x16xf32> to vector<8x16xbf16>
      %cst_31 = arith.constant dense<0.000000e+00> : vector<8x128xf32>
      %49 = tpu.matmul %48, %44, %cst_31 {dimension_numbers = #tpu.dot_dimension_numbers<[1], [0], [0], [1], [0, 0, 1, 1], [], []>} : vector<8x16xbf16>, vector<16x128xbf16>, vector<8x128xf32> -> vector<8x128xf32>
      %cst_32 = arith.constant dense<0.000000e+00> : vector<128xf32>
      %50 = vector.multi_reduction <add>, %49, %cst_32 [0] : vector<8x128xf32> to vector<128xf32>
      %51 = vector.shape_cast %50 : vector<128xf32> to vector<1x128xf32>
      %cst_33 = arith.constant 8.000000e+00 : f32
      %52 = vector.broadcast %cst_33 : f32 to vector<1x128xf32>
      %53 = arith.divf %51, %52 : vector<1x128xf32>
      %54 = vector.broadcast %53 : vector<1x128xf32> to vector<8x128xf32>
      %55 = arith.subf %49, %54 : vector<8x128xf32>
      %56 = arith.mulf %55, %55 : vector<8x128xf32>
      %cst_34 = arith.constant dense<0.000000e+00> : vector<128xf32>
      %57 = vector.multi_reduction <add>, %56, %cst_34 [0] : vector<8x128xf32> to vector<128xf32>
      %58 = vector.shape_cast %57 : vector<128xf32> to vector<1x128xf32>
      %cst_35 = arith.constant 8.000000e+00 : f32
      %59 = vector.broadcast %cst_35 : f32 to vector<1x128xf32>
      %60 = arith.divf %58, %59 : vector<1x128xf32>
      %cst_36 = arith.constant 9.99999974E-6 : f32
      %61 = vector.broadcast %cst_36 : f32 to vector<1x128xf32>
      %62 = arith.addf %60, %61 : vector<1x128xf32>
      %63 = math.rsqrt %62 : vector<1x128xf32>
      %64 = arith.mulf %45, %63 : vector<1x128xf32>
      %65 = arith.mulf %53, %64 : vector<1x128xf32>
      %66 = arith.subf %46, %65 : vector<1x128xf32>
      %67 = vector.broadcast %64 : vector<1x128xf32> to vector<8x128xf32>
      %68 = arith.mulf %49, %67 : vector<8x128xf32>
      %69 = vector.broadcast %66 : vector<1x128xf32> to vector<8x128xf32>
      %70 = arith.addf %68, %69 : vector<8x128xf32>
      %cst_37 = arith.constant 0.000000e+00 : f32
      %71 = vector.broadcast %cst_37 : f32 to vector<8x128xf32>
      %72 = arith.maximumf %70, %71 : vector<8x128xf32>
      %73 = arith.truncf %72 : vector<8x128xf32> to vector<8x128xbf16>
      %c0_38 = arith.constant 0 : index
      %c0_39 = arith.constant 0 : index
      %74 = vector.load %arg9[%c0_38, %c0_39] : memref<8x128xbf16, #tpu.memory_space<vmem>>, vector<8x128xbf16>
      tpu.vector_store %arg9[%c0_38, %c0_39], %73 {strides = array<i32>} : memref<8x128xbf16, #tpu.memory_space<vmem>>, vector<8x128xbf16>,
      %c0_40 = arith.constant 0 : index
      %c0_41 = arith.constant 0 : index
      %75 = vector.load %arg2[%c0_40, %c0_41] : memref<8x16xf32, #tpu.memory_space<vmem>>, vector<8x16xf32>
      %76 = arith.truncf %75 : vector<8x16xf32> to vector<8x16xbf16>
      %cst_42 = arith.constant dense<0.000000e+00> : vector<8x128xf32>
      %77 = tpu.matmul %76, %44, %cst_42 {dimension_numbers = #tpu.dot_dimension_numbers<[1], [0], [0], [1], [0, 0, 1, 1], [], []>} : vector<8x16xbf16>, vector<16x128xbf16>, vector<8x128xf32> -> vector<8x128xf32>
      %cst_43 = arith.constant dense<0.000000e+00> : vector<128xf32>
      %78 = vector.multi_reduction <add>, %77, %cst_43 [0] : vector<8x128xf32> to vector<128xf32>
      %79 = vector.shape_cast %78 : vector<128xf32> to vector<1x128xf32>
      %cst_44 = arith.constant 8.000000e+00 : f32
      %80 = vector.broadcast %cst_44 : f32 to vector<1x128xf32>
      %81 = arith.divf %79, %80 : vector<1x128xf32>
      %82 = vector.broadcast %81 : vector<1x128xf32> to vector<8x128xf32>
      %83 = arith.subf %77, %82 : vector<8x128xf32>
      %84 = arith.mulf %83, %83 : vector<8x128xf32>
      %cst_45 = arith.constant dense<0.000000e+00> : vector<128xf32>
      %85 = vector.multi_reduction <add>, %84, %cst_45 [0] : vector<8x128xf32> to vector<128xf32>
      %86 = vector.shape_cast %85 : vector<128xf32> to vector<1x128xf32>
      %cst_46 = arith.constant 8.000000e+00 : f32
      %87 = vector.broadcast %cst_46 : f32 to vector<1x128xf32>
      %88 = arith.divf %86, %87 : vector<1x128xf32>
      %cst_47 = arith.constant 9.99999974E-6 : f32
      %89 = vector.broadcast %cst_47 : f32 to vector<1x128xf32>
      %90 = arith.addf %88, %89 : vector<1x128xf32>
      %91 = math.rsqrt %90 : vector<1x128xf32>
      %92 = arith.mulf %45, %91 : vector<1x128xf32>
      %93 = arith.mulf %81, %92 : vector<1x128xf32>
      %94 = arith.subf %46, %93 : vector<1x128xf32>
      %95 = vector.broadcast %92 : vector<1x128xf32> to vector<8x128xf32>
      %96 = arith.mulf %77, %95 : vector<8x128xf32>
      %97 = vector.broadcast %94 : vector<1x128xf32> to vector<8x128xf32>
      %98 = arith.addf %96, %97 : vector<8x128xf32>
      %cst_48 = arith.constant 0.000000e+00 : f32
      %99 = vector.broadcast %cst_48 : f32 to vector<8x128xf32>
      %100 = arith.maximumf %98, %99 : vector<8x128xf32>
      %101 = arith.truncf %100 : vector<8x128xf32> to vector<8x128xbf16>
      %c0_49 = arith.constant 0 : index
      %c0_50 = arith.constant 0 : index
      %102 = vector.load %arg10[%c0_49, %c0_50] : memref<8x128xbf16, #tpu.memory_space<vmem>>, vector<8x128xbf16>
      tpu.vector_store %arg10[%c0_49, %c0_50], %101 {strides = array<i32>} : memref<8x128xbf16, #tpu.memory_space<vmem>>, vector<8x128xbf16>,
    } else {
    }
    %c0 = arith.constant 0 : index
    %c0_1 = arith.constant 0 : index
    %3 = vector.load %arg9[%c0, %c0_1] : memref<8x128xbf16, #tpu.memory_space<vmem>>, vector<8x128xbf16>
    %c0_2 = arith.constant 0 : index
    %c0_3 = arith.constant 0 : index
    %4 = vector.load %arg6[%c0_2, %c0_3] : memref<288x128xbf16, #tpu.memory_space<vmem>>, vector<128x128xbf16>
    %cst = arith.constant dense<0.000000e+00> : vector<8x128xf32>
    %5 = tpu.matmul %3, %4, %cst {dimension_numbers = #tpu.dot_dimension_numbers<[1], [0], [0], [1], [0, 0, 1, 1], [], []>} : vector<8x128xbf16>, vector<128x128xbf16>, vector<8x128xf32> -> vector<8x128xf32>
    %c0_4 = arith.constant 0 : index
    %c0_5 = arith.constant 0 : index
    %6 = vector.load %arg10[%c0_4, %c0_5] : memref<8x128xbf16, #tpu.memory_space<vmem>>, vector<8x128xbf16>
    %c128 = arith.constant 128 : index
    %c0_6 = arith.constant 0 : index
    %7 = vector.load %arg6[%c128, %c0_6] : memref<288x128xbf16, #tpu.memory_space<vmem>>, vector<128x128xbf16>
    %cst_7 = arith.constant dense<0.000000e+00> : vector<8x128xf32>
    %8 = tpu.matmul %6, %7, %cst_7 {dimension_numbers = #tpu.dot_dimension_numbers<[1], [0], [0], [1], [0, 0, 1, 1], [], []>} : vector<8x128xbf16>, vector<128x128xbf16>, vector<8x128xf32> -> vector<8x128xf32>
    %9 = arith.addf %5, %8 : vector<8x128xf32>
    %c0_8 = arith.constant 0 : index
    %c0_9 = arith.constant 0 : index
    %10 = vector.load %arg3[%c0_8, %c0_9] : memref<8x32xf32, #tpu.memory_space<vmem>>, vector<8x32xf32>
    %11 = arith.truncf %10 : vector<8x32xf32> to vector<8x32xbf16>
    %c256 = arith.constant 256 : index
    %c0_10 = arith.constant 0 : index
    %12 = vector.load %arg6[%c256, %c0_10] : memref<288x128xbf16, #tpu.memory_space<vmem>>, vector<32x128xbf16>
    %cst_11 = arith.constant dense<0.000000e+00> : vector<8x128xf32>
    %13 = tpu.matmul %11, %12, %cst_11 {dimension_numbers = #tpu.dot_dimension_numbers<[1], [0], [0], [1], [0, 0, 1, 1], [], []>} : vector<8x32xbf16>, vector<32x128xbf16>, vector<8x128xf32> -> vector<8x128xf32>
    %14 = arith.addf %9, %13 : vector<8x128xf32>
    %c0_12 = arith.constant 0 : index
    %c0_13 = arith.constant 0 : index
    %15 = vector.load %arg7[%c0_12, %c0_13] : memref<2x128xf32, #tpu.memory_space<vmem>>, vector<1x128xf32>
    %c1 = arith.constant 1 : index
    %c0_14 = arith.constant 0 : index
    %16 = vector.load %arg7[%c1, %c0_14] : memref<2x128xf32, #tpu.memory_space<vmem>>, vector<1x128xf32>
    %cst_15 = arith.constant dense<0.000000e+00> : vector<128xf32>
    %17 = vector.multi_reduction <add>, %14, %cst_15 [0] : vector<8x128xf32> to vector<128xf32>
    %18 = vector.shape_cast %17 : vector<128xf32> to vector<1x128xf32>
    %cst_16 = arith.constant 8.000000e+00 : f32
    %19 = vector.broadcast %cst_16 : f32 to vector<1x128xf32>
    %20 = arith.divf %18, %19 : vector<1x128xf32>
    %21 = vector.broadcast %20 : vector<1x128xf32> to vector<8x128xf32>
    %22 = arith.subf %14, %21 : vector<8x128xf32>
    %23 = arith.mulf %22, %22 : vector<8x128xf32>
    %cst_17 = arith.constant dense<0.000000e+00> : vector<128xf32>
    %24 = vector.multi_reduction <add>, %23, %cst_17 [0] : vector<8x128xf32> to vector<128xf32>
    %25 = vector.shape_cast %24 : vector<128xf32> to vector<1x128xf32>
    %cst_18 = arith.constant 8.000000e+00 : f32
    %26 = vector.broadcast %cst_18 : f32 to vector<1x128xf32>
    %27 = arith.divf %25, %26 : vector<1x128xf32>
    %cst_19 = arith.constant 9.99999974E-6 : f32
    %28 = vector.broadcast %cst_19 : f32 to vector<1x128xf32>
    %29 = arith.addf %27, %28 : vector<1x128xf32>
    %30 = math.rsqrt %29 : vector<1x128xf32>
    %31 = arith.mulf %15, %30 : vector<1x128xf32>
    %32 = arith.mulf %20, %31 : vector<1x128xf32>
    %33 = arith.subf %16, %32 : vector<1x128xf32>
    %34 = vector.broadcast %31 : vector<1x128xf32> to vector<8x128xf32>
    %35 = arith.mulf %14, %34 : vector<8x128xf32>
    %36 = vector.broadcast %33 : vector<1x128xf32> to vector<8x128xf32>
    %37 = arith.addf %35, %36 : vector<8x128xf32>
    %38 = arith.negf %37 : vector<8x128xf32>
    %39 = math.exp %38 : vector<8x128xf32>
    %cst_20 = arith.constant 1.000000e+00 : f32
    %40 = vector.broadcast %cst_20 : f32 to vector<8x128xf32>
    %41 = arith.addf %40, %39 : vector<8x128xf32>
    %42 = arith.divf %40, %41 : vector<8x128xf32>
    %c0_21 = arith.constant 0 : index
    %c0_22 = arith.constant 0 : index
    %43 = vector.load %arg8[%c0_21, %c0_22] : memref<8x128xf32, #tpu.memory_space<vmem>>, vector<8x128xf32>
    tpu.vector_store %arg8[%c0_21, %c0_22], %42 {strides = array<i32>} : memref<8x128xf32, #tpu.memory_space<vmem>>, vector<8x128xf32>,
    return
  }
  func.func @transform_0(%arg0: i32) -> (i32, i32) {
    %c0_i32 = arith.constant 0 : i32
    %c0_i32_0 = arith.constant 0 : i32
    %c0_i32_1 = arith.constant 0 : i32
    return %c0_i32, %c0_i32_0 : i32, i32
  }
  func.func @transform_1(%arg0: i32) -> (i32, i32) {
    %c0_i32 = arith.constant 0 : i32
    %c0_i32_0 = arith.constant 0 : i32
    %c0_i32_1 = arith.constant 0 : i32
    return %c0_i32, %c0_i32_0 : i32, i32
  }
  func.func @transform_2(%arg0: i32) -> (i32, i32) {
    %c0_i32 = arith.constant 0 : i32
    %c0_i32_0 = arith.constant 0 : i32
    %c0_i32_1 = arith.constant 0 : i32
    return %c0_i32, %c0_i32_0 : i32, i32
  }
  func.func @transform_3(%arg0: i32) -> (i32, i32) {
    %c0_i32 = arith.constant 0 : i32
    %c0_i32_0 = arith.constant 0 : i32
    %c0_i32_1 = arith.constant 0 : i32
    return %c0_i32, %c0_i32_0 : i32, i32
  }
  func.func @transform_4(%arg0: i32) -> (i32, i32) {
    %c0_i32 = arith.constant 0 : i32
    %c0_i32_0 = arith.constant 0 : i32
    %c0_i32_1 = arith.constant 0 : i32
    return %c0_i32, %c0_i32_0 : i32, i32
  }
  func.func @transform_5(%arg0: i32) -> (i32, i32) {
    %c0_i32 = arith.constant 0 : i32
    %c0_i32_0 = arith.constant 0 : i32
    return %c0_i32, %arg0 : i32, i32
  }
  func.func @transform_6(%arg0: i32) -> (i32, i32) {
    %c0_i32 = arith.constant 0 : i32
    %c0_i32_0 = arith.constant 0 : i32
    return %c0_i32, %arg0 : i32, i32
  }
  func.func @transform_7(%arg0: i32) -> (i32, i32) {
    %c0_i32 = arith.constant 0 : i32
    %c0_i32_0 = arith.constant 0 : i32
    return %c0_i32, %arg0 : i32, i32
  }
}

</mosaic_0001>

<bundles_post_ra>
// kernel: tpu_custom_call.1
= control target key start
LH: loop header
LB: loop body
LE: loop exit
PB: predicated region body
PF: predicated region fallthrough
CT: control target
= control target key end

     0   :  { %12 = vsyncpa [#allocation5], 0  ;;  %s1020_s0 = inlined_call_operand.hbm [shape: f32[8,16], index: 0, kind: input, shape index: {}]   ;;  %s1021_s1 = inlined_call_operand.hbm [shape: f32[8,16], index: 1, kind: input, shape index: {}]   ;;  %s1022_s2 = inlined_call_operand.hbm [shape: f32[8,32], index: 2, kind: input, shape index: {}]   ;;  %s1023_s3 = inlined_call_operand.vmem [shape: bf16[16,128], index: 3, kind: input, shape index: {}]   ;;  %s1024_s4 = inlined_call_operand.vmem [shape: f32[2,128], index: 4, kind: input, shape index: {}]   ;;  %s1025_s5 = inlined_call_operand.hbm [shape: bf16[288,128], index: 5, kind: input, shape index: {}]   ;;  %s1026_s6 = inlined_call_operand.vmem [shape: f32[2,128], index: 6, kind: input, shape index: {}]   ;;  %s1027_s7 = inlined_call_operand.hbm [shape: f32[8,128], index: 7, kind: output, shape index: {}]  }
   0x1   :  { %13 = vsyncpa [#allocation8], 0 }
   0x2   :  { %14 = vsyncpa [#allocation11], 0 }
   0x3   :  { %15 = vsyncpa [#allocation6], 0  ;;  %s851_s24 = smov [#allocation7]   ;;  %s852_s26 = smov [#allocation4]  }
   0x4   :  { %s32_s25 = sshll.u32 %s851_s24, 4  ;;  %s22_s27 = sshll.u32 %s852_s26, 4  ;;  %s33_s25 = int_to_ptr.vmem [resolvable:$true] %s32_s25  ;;  %s23_s27 = int_to_ptr.vmem [resolvable:$true] %s22_s27 }
   0x5   :  { %s733_s30 = scalar_lea.hbm %s1021_s1, 128 }
   0x6   :  { %p734_p0 = scmp.ne.s32.totalorder %s1021_s1, %s733_s30  ;;  %p737_p1 = scmp.lt.u32.totalorder %s733_s30, %s1021_s1 }
   0x8   :  { %p739_p2 = pnand %p737_p1, %p734_p0 }
   0xa   :  { %742 = shalt.err (!%p739_p2)
}
   0xb   :  { %s743_s12 = scalar_lea.vmem %s33_s25, 128  ;;  %p748_p4 = scmp.lt.s32.totalorder %s33_s25, %s33_s25 }
   0xc   :  { %p744_p3 = scmp.ne.s32.totalorder %s33_s25, %s743_s12  ;;  %p749_p5 = scmp.lt.s32.totalorder %s743_s12, %s743_s12 }
   0xe   :  { %p750_p6 = por %p749_p5, %p748_p4 }
  0x10   :  { %p751_p7 = pnand %p750_p6, %p744_p3 }
  0x12   :  { %754 = shalt.err (!%p751_p7)
}
  0x13   :  { %35 = dma.hbm_to_vmem [thread:$0]  %s1021_s1, 128, %s33_s25, [#allocation8]  }
  0x14   :  { %s755_s17 = scalar_lea.hbm %s1020_s0, 128 }
  0x15   :  { %p756_p8 = scmp.ne.s32.totalorder %s1020_s0, %s755_s17  ;;  %p759_p9 = scmp.lt.u32.totalorder %s755_s17, %s1020_s0 }
  0x17   :  { %p761_p10 = pnand %p759_p9, %p756_p8 }
  0x19   :  { %764 = shalt.err (!%p761_p10)
}
  0x1a   :  { %s765_s22 = scalar_lea.vmem %s23_s27, 128  ;;  %p770_p12 = scmp.lt.s32.totalorder %s23_s27, %s23_s27 }
  0x1b   :  { %p766_p11 = scmp.ne.s32.totalorder %s23_s27, %s765_s22  ;;  %p771_p13 = scmp.lt.s32.totalorder %s765_s22, %s765_s22 }
  0x1d   :  { %p772_p0 = por %p771_p13, %p770_p12 }
  0x1f   :  { %p773_p1 = pnand %p772_p0, %p766_p11 }
  0x21   :  { %776 = shalt.err (!%p773_p1)
}
  0x22   :  { %25 = dma.hbm_to_vmem [thread:$0]  %s1020_s0, 128, %s23_s27, [#allocation5]  }
  0x23   :  { %s853_s24 = smov [#allocation9]   ;;  %s854_s26 = smov [#allocation10]  }
  0x24   :  { %s42_s25 = sshll.u32 %s853_s24, 4  ;;  %s55_s28 = sshll.u32 %s854_s26, 4  ;;  %s43_s25 = int_to_ptr.vmem [resolvable:$true] %s42_s25  ;;  %s924_s28 = int_to_ptr.vmem [resolvable:$true] %s55_s28 }
  0x25   :  { %s777_s8 = scalar_lea.hbm %s1022_s2, 128 }
  0x26   :  { %p778_p2 = scmp.ne.s32.totalorder %s1022_s2, %s777_s8  ;;  %p781_p3 = scmp.lt.u32.totalorder %s777_s8, %s1022_s2 }
  0x28   :  { %p783_p4 = pnand %p781_p3, %p778_p2 }
  0x2a   :  { %786 = shalt.err (!%p783_p4)
}
  0x2b   :  { %s787_s0 = scalar_lea.vmem %s43_s25, 128  ;;  %p792_p6 = scmp.lt.s32.totalorder %s43_s25, %s43_s25 }
  0x2c   :  { %p788_p5 = scmp.ne.s32.totalorder %s43_s25, %s787_s0  ;;  %p793_p7 = scmp.lt.s32.totalorder %s787_s0, %s787_s0 }
  0x2e   :  { %p794_p8 = por %p793_p7, %p792_p6 }
  0x30   :  { %p795_p9 = pnand %p794_p8, %p788_p5 }
  0x32   :  { %798 = shalt.err (!%p795_p9)
}
  0x33   :  { %45 = dma.hbm_to_vmem [thread:$0]  %s1022_s2, 128, %s43_s25, [#allocation8]  }
  0x34   :  { %s799_s16 = scalar_lea.hbm %s1025_s5, 2304 }
  0x35   :  { %p800_p10 = scmp.ne.s32.totalorder %s1025_s5, %s799_s16  ;;  %p803_p11 = scmp.lt.u32.totalorder %s799_s16, %s1025_s5 }
  0x37   :  { %p805_p12 = pnand %p803_p11, %p800_p10 }
  0x39   :  { %808 = shalt.err (!%p805_p12)
}
  0x3a   :  { %s809_s21 = scalar_lea.vmem %s924_s28, 2304  ;;  %p814_p0 = scmp.lt.s32.totalorder %s924_s28, %s924_s28 }
  0x3b   :  { %p810_p13 = scmp.ne.s32.totalorder %s924_s28, %s809_s21  ;;  %p815_p1 = scmp.lt.s32.totalorder %s809_s21, %s809_s21 }
  0x3d   :  { %p816_p2 = por %p815_p1, %p814_p0 }
  0x3f   :  { %p817_p3 = pnand %p816_p2, %p810_p13 }
  0x41   :  { %820 = shalt.err (!%p817_p3)
}
  0x42   :  { %s855_s2 = smov 64   ;;  %s856_s22 = smov 4  }
  0x43   :  { %61 = dma.hbm_to_vmem [thread:$0]  %s1025_s5, 2304, %s924_s28, [#allocation11], %s855_s2, %s855_s2, %s856_s22  }
  0x44   :  { %843 = dma.done.wait [#allocation5], 128  }
  0x45   :  { %844 = vsyncadd [#allocation5], 4294967168 }
  0x46   :  { %845 = dma.done.wait [#allocation8], 256  }
  0x47   :  { %846 = vsyncadd [#allocation8], 4294967040 }
  0x48   :  { %847 = dma.done.wait [#allocation11], 2304  }
  0x49   :  { %848 = vsyncadd [#allocation11], 4294964992  ;;  %v857_v0 = vmov 0.0   ;;  %vm858_vm0 = vmmov 0   ;;  %v704_v1 = vld [vmem:[%s1023_s3] sm:$0xff]   ;;  %v85_v2 = vld [vmem:[#allocation4] sm:$0xff] }
  0x4a   :  { %630 = vmatprep.subr.bf16.mxu0 %v857_v0  ;;  %636 = vmatprep.subr.bf16.mxu1 %v857_v0  ;;  %v172_v3 = vld [vmem:[#allocation7] sm:$0xff]  ;;  %v86_v4 = vpack.c.bf16 %v85_v2, %v85_v2  ;;  %vm93_vm1 = vcmask 130048   ;;  %v705_v6 = vld [vmem:[#allocation10] sm:$0xff]   ;;  %v707_v8 = vld [vmem:[#allocation10 + $0x8] sm:$0xff]   ;;  %vm479_vm2 = vcmask 261120   ;;  %s859_s9 = smov [#allocation12]  }
  0x4b   :  { %632 = vmatprep.mubr.msk.bf16.mxu0 %vm858_vm0, %v857_v0  ;;  %638 = vmatprep.mubr.msk.bf16.mxu1 %vm858_vm0, %v857_v0  ;;  %v173_v5 = vpack.c.bf16 %v172_v3, %v172_v3  ;;  %v706_v7 = vld [vmem:[#allocation10 + $0x40] sm:$0xff]   ;;  %v708_v9 = vld [vmem:[#allocation10 + $0x48] sm:$0xff]   ;;  %v709_v10 = vld [vmem:[#allocation10 + $0x10] sm:$0xff]   ;;  %s571_s10 = sshll.u32 %s859_s9, 4  ;;  %s572_s10 = int_to_ptr.vmem [resolvable:$true] %s571_s10 }
  0x4c   :  { %631 = vmatpush3.bf16.msra.mxu0 %v704_v1  ;;  %637 = vmatpush3.bf16.msra.mxu1 %v704_v1  ;;  %v710_v11 = vld [vmem:[#allocation10 + $0x50] sm:$0xff]   ;;  %v711_v12 = vld [vmem:[#allocation10 + $0x18] sm:$0xff]   ;;  %v713_v14 = vld [vmem:[#allocation10 + $0x20] sm:$0xff]   ;;  %v159_v1 = vlaneseq  ;;  %s821_s11 = scalar_lea.vmem %s572_s10, 128  ;;  %p826_p5 = scmp.lt.s32.totalorder %s572_s10, %s572_s10 }
  0x4d   :  { %662 = vmatprep.subr.bf16.mxu0 %v857_v0  ;;  %642 = vmatprep.subr.bf16.mxu1 %v857_v0  ;;  %v712_v13 = vld [vmem:[#allocation10 + $0x58] sm:$0xff]   ;;  %v714_v15 = vld [vmem:[#allocation10 + $0x60] sm:$0xff]   ;;  %v715_v16 = vld [vmem:[#allocation10 + $0x28] sm:$0xff]   ;;  %p822_p4 = scmp.ne.s32.totalorder %s572_s10, %s821_s11  ;;  %p827_p6 = scmp.lt.s32.totalorder %s821_s11, %s821_s11 }
  0x4e   :  { %v716_v17 = vld [vmem:[#allocation10 + $0x68] sm:$0xff]   ;;  %v717_v18 = vld [vmem:[#allocation10 + $0x30] sm:$0xff]   ;;  %v719_v20 = vld [vmem:[#allocation10 + $0x38] sm:$0xff]   ;;  %v160_v2 = vshrl.u32 %v159_v1, 7 }
  0x4f   :  { %633 = vmatmul.mubr.msk.bf16.vlgmr.msra.gmra.mrb[0].mxu0 %vm93_vm1, %v86_v4  ;;  %639 = vmatmul.mubr.msk.bf16.vlgmr.msra.gmra.mrb[0].mxu1 %vm93_vm1, %v173_v5  ;;  %v718_v19 = vld [vmem:[#allocation10 + $0x70] sm:$0xff]   ;;  %v720_v21 = vld [vmem:[#allocation10 + $0x78] sm:$0xff]   ;;  %v83_v3 = vld [vmem:[%s1024_s4] sm:$0x1]  ;;  %p828_p7 = por %p827_p6, %p826_p5 }
  0x50   :  { %658 = vmatprep.mubr.msk.bf16.mxu1 %vm858_vm0, %v857_v0  ;;  %678 = vmatprep.mubr.msk.bf16.mxu0 %vm858_vm0, %v857_v0  ;;  %v988_v4 = vsub.s32 0, %v160_v2 }
  0x51   :  { %663 = vmatpush3.bf16.msra.mxu0 %v705_v6  ;;  %643 = vmatpush3.bf16.msra.mxu1 %v706_v7  ;;  %p829_p8 = pnand %p828_p7, %p822_p4 }
  0x52   :  { %664 = vmatprep.subr.bf16.mxu0 %v857_v0  ;;  %644 = vmatprep.subr.bf16.mxu1 %v857_v0 }
  0x55   :  { %665 = vmatpush3.bf16.msra.mxu0 %v707_v8  ;;  %645 = vmatpush3.bf16.msra.mxu1 %v708_v9  ;;  %v84_v8 = vld [vmem:[%s1024_s4 + $0x1] sm:$0x1] }
  0x56   :  { %666 = vmatprep.subr.bf16.mxu0 %v857_v0  ;;  %646 = vmatprep.subr.bf16.mxu1 %v857_v0 }
  0x59   :  { %667 = vmatpush3.bf16.msra.mxu0 %v709_v10  ;;  %647 = vmatpush3.bf16.msra.mxu1 %v710_v11 }
  0x5a   :  { %668 = vmatprep.subr.bf16.mxu0 %v857_v0  ;;  %648 = vmatprep.subr.bf16.mxu1 %v857_v0 }
  0x5d   :  { %669 = vmatpush3.bf16.msra.mxu0 %v711_v12  ;;  %649 = vmatpush3.bf16.msra.mxu1 %v712_v13 }
  0x5e   :  { %670 = vmatprep.subr.bf16.mxu0 %v857_v0  ;;  %650 = vmatprep.subr.bf16.mxu1 %v857_v0 }
  0x61   :  { %671 = vmatpush3.bf16.msra.mxu0 %v713_v14  ;;  %651 = vmatpush3.bf16.msra.mxu1 %v714_v15 }
  0x62   :  { %672 = vmatprep.subr.bf16.mxu0 %v857_v0  ;;  %652 = vmatprep.subr.bf16.mxu1 %v857_v0 }
  0x65   :  { %673 = vmatpush3.bf16.msra.mxu0 %v715_v16  ;;  %653 = vmatpush3.bf16.msra.mxu1 %v716_v17 }
  0x66   :  { %674 = vmatprep.subr.bf16.mxu0 %v857_v0  ;;  %654 = vmatprep.subr.bf16.mxu1 %v857_v0 }
  0x69   :  { %675 = vmatpush3.bf16.msra.mxu0 %v717_v18  ;;  %655 = vmatpush3.bf16.msra.mxu1 %v718_v19 }
  0x6a   :  { %676 = vmatprep.subr.bf16.mxu0 %v857_v0  ;;  %656 = vmatprep.subr.bf16.mxu1 %v857_v0 }
  0x6d   :  { %677 = vmatpush3.bf16.msra.mxu0 %v719_v20  ;;  %657 = vmatpush3.bf16.msra.mxu1 %v720_v21 }
  0x6e   :  { %682 = vmatprep.subr.bf16.mxu0 %v857_v0 }
 0x122   :  { %v131_v22 = vpop.f32.mrb[0].mxu0  ;;  %v211_v23 = vpop.f32.mrb[0].mxu1 }
 0x123   :  { %v137_v24 = vrot.slane %v131_v22, 4  ;;  %v217_v25 = vrot.slane %v211_v23, 4  ;;  %v634_v26 = vpop.f32.mrb[1].mxu0  ;;  %v640_v27 = vpop.f32.mrb[1].mxu1 }
 0x124   :  { %v134_v28 = vpop.f32.mrb[2].mxu0  ;;  %v214_v29 = vpop.f32.mrb[2].mxu1 }
 0x125   :  { %v138_v30 = vadd.f32 %v137_v24, %v131_v22  ;;  %v218_v31 = vadd.f32 %v217_v25, %v211_v23  ;;  %v635_v32 = vpop.f32.mrb[3].mxu0  ;;  %v641_v33 = vpop.f32.mrb[3].mxu1  ;;  %v721_v28 = vld [vmem:[#allocation10 + $0x80] sm:$0xff]  }
 0x127   :  { %v139_v34 = vrot.slane %v138_v30, 2  ;;  %v219_v35 = vrot.slane %v218_v31, 2 }
 0x129   :  { %v140_v36 = vadd.f32 %v139_v34, %v138_v30  ;;  %v220_v37 = vadd.f32 %v219_v35, %v218_v31 }
 0x12b   :  { %v141_v38 = vrot.slane %v140_v36, 1  ;;  %v221_v39 = vrot.slane %v220_v37, 1 }
 0x12d   :  { %v142_v40 = vadd.f32 %v141_v38, %v140_v36  ;;  %v222_v41 = vadd.f32 %v221_v39, %v220_v37 }
 0x12f   :  { %v144_v42 = vmul.f32 0.125, %v142_v40  ;;  %v223_v43 = vmul.f32 0.125, %v222_v41 }
 0x131   :  { %v145_v44 = vsub.f32 %v131_v22, %v144_v42  ;;  %v224_v45 = vsub.f32 %v211_v23, %v223_v43 }
 0x133   :  { %v146_v46 = vmul.f32 %v145_v44, %v145_v44  ;;  %v225_v47 = vmul.f32 %v224_v45, %v224_v45 }
 0x135   :  { %v147_v48 = vrot.slane %v146_v46, 4  ;;  %v226_v49 = vrot.slane %v225_v47, 4 }
 0x137   :  { %v148_v50 = vadd.f32 %v147_v48, %v146_v46  ;;  %v227_v51 = vadd.f32 %v226_v49, %v225_v47 }
 0x139   :  { %v149_v52 = vrot.slane %v148_v50, 2  ;;  %v228_v53 = vrot.slane %v227_v51, 2 }
 0x13b   :  { %v150_v54 = vadd.f32 %v149_v52, %v148_v50  ;;  %v229_v55 = vadd.f32 %v228_v53, %v227_v51 }
 0x13d   :  { %v151_v56 = vrot.slane %v150_v54, 1  ;;  %v230_v57 = vrot.slane %v229_v55, 1 }
 0x13f   :  { %v152_v58 = vadd.f32 %v151_v56, %v150_v54  ;;  %v231_v59 = vadd.f32 %v230_v57, %v229_v55  ;;  %v524_v57 = vld [vmem:[%s1026_s6] sm:$0x1] }
 0x141   :  { %v153_v60 = vmul.f32 0.125, %v152_v58  ;;  %v232_v61 = vmul.f32 0.125, %v231_v59 }
 0x143   :  { %v154_v62 = vadd.f32 1e-05, %v153_v60  ;;  %v233_v63 = vadd.f32 1e-05, %v232_v61  ;;  %v525_v60 = vld [vmem:[%s1026_s6 + $0x1] sm:$0x1] }
 0x145   :  { %723 = vrsqrt.f32 %v154_v62 }
 0x146   :  { %725 = vrsqrt.f32 %v233_v63 }
 0x14f   :  { %v724_v5 = vpop.eup %723 }
 0x150   :  { %v726_v6 = vpop.eup %725  ;;  %v156_v7 = vmul.f32 %v724_v5, %v83_v3 }
 0x151   :  { %v235_v9 = vmul.f32 %v726_v6, %v83_v3 }
 0x152   :  { %v157_v10 = vmul.f32 %v156_v7, %v144_v42  ;;  %v162_v11 = vrot.slane %v156_v7, %v988_v4 }
 0x153   :  { %v236_v12 = vmul.f32 %v235_v9, %v223_v43  ;;  %v241_v13 = vrot.slane %v235_v9, %v988_v4 }
 0x154   :  { %v158_v14 = vsub.f32 %v84_v8, %v157_v10  ;;  %v163_v16 = vmul.f32 %v162_v11, %v131_v22  ;;  %v722_v22 = vld [vmem:[#allocation10 + $0x88] sm:$0xff]  }
 0x155   :  { %v237_v15 = vsub.f32 %v84_v8, %v236_v12  ;;  %v242_v18 = vmul.f32 %v241_v13, %v211_v23  ;;  %v461_v23 = vld [vmem:[#allocation9] sm:$0xff] }
 0x156   :  { %v167_v17 = vrot.slane %v158_v14, %v988_v4  ;;  %v462_v31 = vpack.c.bf16 %v461_v23, %v461_v23 }
 0x157   :  { %v246_v19 = vrot.slane %v237_v15, %v988_v4 }
 0x158   :  { %v168_v20 = vadd.f32 %v167_v17, %v163_v16 }
 0x159   :  { %v247_v21 = vadd.f32 %v246_v19, %v242_v18 }
 0x15a   :  { %v169_v24 = vmax.f32 %v168_v20, 0.0 }
 0x15b   :  { %v248_v25 = vmax.f32 %v247_v21, 0.0 }
 0x15c   :  { %v170_v26 = vpack.c.bf16 %v169_v24, %v169_v24 }
 0x15d   :  { %v249_v27 = vpack.c.bf16 %v248_v25, %v248_v25 }
 0x15e   :  { %171 = vst [vmem:[#allocation2] sm:$0xf] %v170_v26 }
 0x15f   :  { %250 = vst [vmem:[#allocation3] sm:$0xf] %v249_v27 }
 0x165   :  { %v251_v29 = vld [vmem:[#allocation2] sm:$0xf] }
 0x166   :  { %v268_v30 = vld [vmem:[#allocation3] sm:$0xf]  ;;  %679 = vmatmul.mubr.bf16.vlgmr.msra.gmra.mrb[4].mxu0 %v251_v29 }
 0x167   :  { %659 = vmatmul.mubr.bf16.vlgmr.msra.gmra.mrb[4].mxu1 %v268_v30  ;;  %683 = vmatpush3.bf16.msra.mxu0 %v721_v28 }
 0x168   :  { %684 = vmatprep.subr.bf16.mxu0 %v857_v0  ;;  %686 = vmatprep.mubr.msk.bf16.mxu0 %vm858_vm0, %v857_v0 }
 0x16b   :  { %685 = vmatpush3.bf16.msra.mxu0 %v722_v22 }
 0x172   :  { %687 = vmatmul.mubr.msk.bf16.vlgmr.msra.gmra.mrb[4].mxu0 %vm479_vm2, %v462_v31 }
 0x23a   :  { %v367_v32 = vpop.f32.mrb[4].mxu1 }
 0x23b   :  { %v660_v33 = vpop.f32.mrb[5].mxu1 }
 0x23c   :  { %v370_v34 = vpop.f32.mrb[6].mxu1 }
 0x23d   :  { %v661_v35 = vpop.f32.mrb[7].mxu1 }
 0x245   :  { %v517_v36 = vpop.f32.mrb[4].mxu0 }
 0x246   :  { %v690_v37 = vadd.f32 %v517_v36, %v367_v32  ;;  %v688_v38 = vpop.f32.mrb[5].mxu0 }
 0x247   :  { %v520_v39 = vpop.f32.mrb[6].mxu0 }
 0x248   :  { %v526_v40 = vrot.slane %v690_v37, 4  ;;  %v689_v41 = vpop.f32.mrb[7].mxu0 }
 0x24a   :  { %v527_v42 = vadd.f32 %v690_v37, %v526_v40 }
 0x24c   :  { %v528_v43 = vrot.slane %v527_v42, 2 }
 0x24e   :  { %v529_v44 = vadd.f32 %v528_v43, %v527_v42 }
 0x250   :  { %v530_v45 = vrot.slane %v529_v44, 1 }
 0x252   :  { %v531_v0 = vadd.f32 %v530_v45, %v529_v44 }
 0x254   :  { %v533_v46 = vmul.f32 0.125, %v531_v0 }
 0x256   :  { %v534_v47 = vsub.f32 %v690_v37, %v533_v46 }
 0x258   :  { %v535_v48 = vmul.f32 %v534_v47, %v534_v47 }
 0x25a   :  { %v536_v49 = vrot.slane %v535_v48, 4 }
 0x25c   :  { %v537_v50 = vadd.f32 %v536_v49, %v535_v48 }
 0x25e   :  { %v538_v51 = vrot.slane %v537_v50, 2 }
 0x260   :  { %v539_v52 = vadd.f32 %v538_v51, %v537_v50 }
 0x262   :  { %v540_v53 = vrot.slane %v539_v52, 1 }
 0x264   :  { %v541_v54 = vadd.f32 %v540_v53, %v539_v52 }
 0x266   :  { %v542_v55 = vmul.f32 0.125, %v541_v54 }
 0x268   :  { %v543_v56 = vadd.f32 1e-05, %v542_v55 }
 0x26a   :  { %727 = vrsqrt.f32 %v543_v56 }
 0x274   :  { %v728_v58 = vpop.eup %727 }
 0x275   :  { %v545_v59 = vmul.f32 %v728_v58, %v524_v57 }
 0x277   :  { %v546_v61 = vmul.f32 %v545_v59, %v533_v46  ;;  %v551_v62 = vrot.slane %v545_v59, %v988_v4 }
 0x279   :  { %v547_v63 = vsub.f32 %v525_v60, %v546_v61  ;;  %v552_v1 = vmul.f32 %v690_v37, %v551_v62 }
 0x27b   :  { %v556_v2 = vrot.slane %v547_v63, %v988_v4 }
 0x27d   :  { %v557_v3 = vadd.f32 %v556_v2, %v552_v1 }
 0x27f   :  { %v604_v5 = vmul.f32 -1.442695, %v557_v3 }
 0x281   :  { %729 = vpow2.f32 %v604_v5 }
 0x28b   :  { %v730_v6 = vpop.eup %729 }
 0x28c   :  { %v561_v7 = vadd.f32 1.0, %v730_v6 }
 0x28e   :  { %731 = vrcp.f32 %v561_v7 }
 0x298   :  { %v732_v8 = vpop.eup %731 }
 0x299   :  { %564 = vst [vmem:[#allocation12] sm:$0xff] %v732_v8 }
 0x29a   :  { %832 = shalt.err (!%p829_p8)
}
 0x29b   :  { %s833_s0 = scalar_lea.hbm %s1027_s7, 128 }
 0x29c   :  { %p834_p9 = scmp.ne.s32.totalorder %s1027_s7, %s833_s0  ;;  %p837_p10 = scmp.lt.u32.totalorder %s833_s0, %s1027_s7 }
 0x29e   :  { %p839_p11 = pnand %p837_p10, %p834_p9 }
 0x2a0   :  { %842 = shalt.err (!%p839_p11)
}
 0x2a1   :  { %574 = dma.vmem_to_hbm [thread:$0]  %s572_s10, 128, %s1027_s7, [#allocation6]  }
 0x2a2   :  { %849 = dma.done.wait [#allocation6], 128  }
 0x2a3   :  { %850 = vsyncadd [#allocation6], 4294967168 }
 0x2a4   :  { %578 = vsyncpa [#allocation5], 1 }
 0x2a5   :  { %579 = vsyncpa [#allocation8], 1 }
 0x2a6   :  { %580 = vsyncpa [#allocation11], 1 }
 0x2a7   :  { %581 = vsyncpa [#allocation6], 1 }

</bundles_post_ra>
